<compile_context>
chip_gen: v7x
topology: tpu7x:2x2x1
jax: 0.10.0
libtpu: 0.0.40
codegen_flags: <defaults>
</compile_context>

<pallas_src>
import math

import jax
import jax.numpy as jnp
from jax import lax
from jax.experimental import pallas as pl
from jax.experimental.pallas import tpu as pltpu


# --------------------------------------------------------------------------- #
# Helpers
# --------------------------------------------------------------------------- #
def _vmem_capacity_bytes():
    try:
        return int(pltpu.get_tpu_info().vmem_capacity_bytes)
    except Exception:
        return 64 << 20          # conservative: v7x per-TensorCore VMEM


def _pick_block_rows(n, row_bytes, target_bytes, need_mult8):
    """Rows of x1 (leading output dim) per grid step, dividing n exactly."""
    ti = max(1, target_bytes // row_bytes)
    if ti >= n:
        return n
    if need_mult8:
        # (ti, n*n) flat block: ti is second-to-last -> multiple of 8 (or == n).
        ti = max(8, (ti // 8) * 8)
        while n % ti and ti > 8:
            ti -= 8
        return ti if n % ti == 0 else n
    # (ti, n, n) block: ti is a leading dim, NOT subject to the (8,128) constraint.
    while n % ti:
        ti -= 1
    return max(1, ti)


# --------------------------------------------------------------------------- #
# Fused small-N path: one launch does matmuls + broadcast-add
# --------------------------------------------------------------------------- #
def _fused_kernel(x1_ref, x2_ref, out_ref):
    x1 = x1_ref[...]
    x2 = x2_ref[...]
    v1 = jnp.dot(x1, x2, preferred_element_type=jnp.float32)          # torch.mm(x1, x2)
    s = v1 + jnp.dot(x2, v1, preferred_element_type=jnp.float32)      # v1 + x2 @ v1
    out_ref[...] = (x1[:, None, :] + s[None, :, :]).astype(out_ref.dtype)


# --------------------------------------------------------------------------- #
# Stage 1 (two-stage path): S = v1 + x2 @ v1, computed once, no grid
# --------------------------------------------------------------------------- #
def _s_kernel(x1_ref, x2_ref, s_ref):
    x1 = x1_ref[...]
    x2 = x2_ref[...]
    v1 = jnp.dot(x1, x2, preferred_element_type=jnp.float32)
    s_ref[...] = v1 + jnp.dot(x2, v1, preferred_element_type=jnp.float32)


def _compute_s(x1, x2, vmem_cap):
    n = x1.shape[0]
    needed = 6 * n * n * 4 + (1 << 20)
    if needed > int(0.8 * vmem_cap):
        # TODO(synk): tile the S matmuls for very large n; the O(n^2) S work is
        # negligible vs the O(n^3) stage-2 writeback, so plain XLA dot is fine here.
        v1 = jnp.dot(x1, x2, preferred_element_type=jnp.float32)
        return v1 + jnp.dot(x2, v1, preferred_element_type=jnp.float32)
    kwargs = {}
    if needed > (14 << 20):
        kwargs["compiler_params"] = pltpu.CompilerParams(
            vmem_limit_bytes=int(min(needed + (4 << 20), 0.9 * vmem_cap)))
    return pl.pallas_call(
        _s_kernel,
        out_shape=jax.ShapeDtypeStruct((n, n), jnp.float32),
        cost_estimate=pl.CostEstimate(flops=4 * n ** 3, transcendentals=0,
                                      bytes_accessed=3 * 4 * n * n),
        **kwargs,
    )(x1, x2)


# --------------------------------------------------------------------------- #
# Stage 2 kernels: streaming broadcast-add  out[i, j, k] = x1[i, k] + S[j, k]
# --------------------------------------------------------------------------- #
def _bcast_3d_kernel(x1_ref, s_ref, out_ref):
    """Direct 3-D path (n % 128 == 0): last dim already lane-dense."""
    out_ref[...] = (x1_ref[...][:, None, :] + s_ref[...][None, :, :]).astype(out_ref.dtype)


_MAX_STATIC_CHUNKS = 32


def _bcast_flat_kernel(x1_ref, s2d_ref, out_ref):
    """Lane-dense flat path.

    x1_ref : (TI, n)            per-tile rows of x1
    s2d_ref: (n_chunks, g*n)    S pre-reshaped so each row is g consecutive S rows
                                (g = lcm(n,128)/n, padded), i.e. a 128-aligned chunk
    out_ref: (TI, n*n)          out2d[i, j*n + k] = x1[i, k] + S[j, k]
    All full-chunk stores are 128-aligned and unmasked; at most one masked tail store.
    """
    ti, n = x1_ref.shape
    gn = s2d_ref.shape[1]
    g = gn // n
    total = n * n
    n_full = total // gn
    rem = total - n_full * gn

    # Lane-replicate the x1 row tile ONCE per grid step (hoisted out of the chunk loop).
    x1_rep = jnp.tile(x1_ref[...], (1, g))                       # (TI, gn), gn % 128 == 0

    if n_full > 0:
        if n_full <= _MAX_STATIC_CHUNKS:
            for c in range(n_full):                              # small static unroll
                out_ref[:, c * gn:(c + 1) * gn] = (
                    x1_rep + s2d_ref[c:c + 1, :]).astype(out_ref.dtype)
        else:
            def body(c, carry):
                start = pl.multiple_of(c * gn, 128)              # 128-aligned chunk offset
                out_ref[:, pl.ds(start, gn)] = (
                    x1_rep + s2d_ref[pl.ds(c, 1), :]).astype(out_ref.dtype)
                return carry
            lax.fori_loop(0, n_full, body, 0, unroll=2)
    if rem:
        out_ref[:, n_full * gn:total] = (
            x1_rep[:, :rem] + s2d_ref[n_full:n_full + 1, :rem]).astype(out_ref.dtype)


# --------------------------------------------------------------------------- #
# Wrapper
# --------------------------------------------------------------------------- #
def model_forward(x1, x2, inp=None, *, block_rows=None, out_dtype=jnp.float32):
    # TODO(synk): `inp` mirrors the PyTorch signature but is unused by the forward pass;
    # `self.subgraph(device=...)` has no JAX/Pallas equivalent (device-placement no-op).
    n = x1.shape[0]
    x1 = x1.astype(jnp.float32)
    x2 = x2.astype(jnp.float32)

    vmem_cap = _vmem_capacity_bytes()
    itemsize = jnp.dtype(out_dtype).itemsize
    out_bytes = n * n * n * itemsize

    # ---------- fused single-launch path (the fuzz-module sizes) ---------------- #
    if block_rows is None and out_bytes <= (2 << 20):
        return pl.pallas_call(
            _fused_kernel,
            out_shape=jax.ShapeDtypeStruct((n, n, n), out_dtype),
            cost_estimate=pl.CostEstimate(flops=5 * n ** 3, transcendentals=0,
                                          bytes_accessed=out_bytes + 2 * 4 * n * n),
        )(x1, x2)

    # ---------- two-stage path --------------------------------------------------- #
    s = _compute_s(x1, x2, vmem_cap)                             # (n, n), computed once

    row_bytes = n * n * itemsize
    target_tile = min(4 << 20, vmem_cap // 8)                    # ~4 MiB, per-generation cap
    cost = pl.CostEstimate(flops=n ** 3, transcendentals=0,
                           bytes_accessed=out_bytes + 8 * n * n)

    if n % 128 == 0:
        ti = block_rows if block_rows else _pick_block_rows(n, row_bytes, target_tile, False)
        if n % ti:
            ti = n
        tile_bytes = ti * row_bytes
        s_bufs = 1 if n >= 256 else 2
        needed = 2 * tile_bytes + s_bufs * 4 * n * n + 2 * 4 * ti * n + (1 << 20)
        if needed > int(0.9 * vmem_cap):
            # TODO(synk): j-axis tiling of S for n too large even at ti=1; XLA fallback.
            return (x1[:, None, :] + s[None, :, :]).astype(out_dtype)
        cp = dict(dimension_semantics=("parallel",))
        if needed > (14 << 20):
            cp["vmem_limit_bytes"] = int(min(needed + (4 << 20), 0.9 * vmem_cap))
        s_spec = (pl.BlockSpec((n, n), lambda i: (0, 0), pipeline_mode=pl.Buffered(1))
                  if n >= 256 else pl.BlockSpec((n, n), lambda i: (0, 0)))
        return pl.pallas_call(
            _bcast_3d_kernel,
            out_shape=jax.ShapeDtypeStruct((n, n, n), out_dtype),
            grid=(n // ti,),
            in_specs=[pl.BlockSpec((ti, n), lambda i: (i, 0)),   # x1 row tile
                      s_spec],                                   # S resident in VMEM
            out_specs=pl.BlockSpec((ti, n, n), lambda i: (i, 0, 0)),
            compiler_params=pltpu.CompilerParams(**cp),
            cost_estimate=cost,
        )(x1, s)

    # General / non-multiple-of-128 path: lane-dense (n, n*n) slab with aligned chunks.
    g = 128 // math.gcd(n, 128)                                  # S rows per aligned chunk
    gn = g * n                                                   # chunk width (mult of 128)
    n_chunks = -(-n // g)
    pad = n_chunks * g - n
    s2d = (jnp.pad(s, ((0, pad), (0, 0))) if pad else s).reshape(n_chunks, gn)

    ti = block_rows if block_rows else _pick_block_rows(n, row_bytes, target_tile, True)
    if n % ti or (ti != n and ti % 8):
        ti = n
    tile_bytes = ti * row_bytes
    s_bufs = 1 if n >= 256 else 2
    needed = 2 * tile_bytes + s_bufs * 4 * n_chunks * gn + 2 * 4 * ti * n + (1 << 20)
    if needed > int(0.9 * vmem_cap):
        # TODO(synk): 2-D (i, j) grid tiling S for very large non-%128 n; XLA fallback.
        return (x1[:, None, :] + s[None, :, :]).astype(out_dtype)
    cp = dict(dimension_semantics=("parallel",))
    if needed > (14 << 20):
        cp["vmem_limit_bytes"] = int(min(needed + (4 << 20), 0.9 * vmem_cap))
    s_spec = (pl.BlockSpec((n_chunks, gn), lambda i: (0, 0), pipeline_mode=pl.Buffered(1))
              if n >= 256 else pl.BlockSpec((n_chunks, gn), lambda i: (0, 0)))
    out2d = pl.pallas_call(
        _bcast_flat_kernel,
        out_shape=jax.ShapeDtypeStruct((n, n * n), out_dtype),
        grid=(n // ti,),
        in_specs=[pl.BlockSpec((ti, n), lambda i: (i, 0)),       # x1 row tile
                  s_spec],                                       # chunked S, VMEM resident
        out_specs=pl.BlockSpec((ti, n * n), lambda i: (i, 0)),
        compiler_params=pltpu.CompilerParams(**cp),
        cost_estimate=cost,
    )(x1, s2d)
    return out2d.reshape(n, n, n)


if __name__ == "__main__":
    def _reference(a, b):
        v1 = a @ b
        p = a[:, None] + b @ v1                  # (N,1,N) + (N,N) -> (N,N,N)
        return v1 + p                            # (N,N) + (N,N,N) -> (N,N,N)

    key = jax.random.PRNGKey(0)
    k0a, k0b, k1, k2, k3, k4, k5 = jax.random.split(key, 7)

    # Case 0: the exact module size (3x3) -> fused single-launch path.
    x1s = jax.random.normal(k0a, (3, 3), dtype=jnp.float32)
    x2s = jax.random.normal(k0b, (3, 3), dtype=jnp.float32)
    outs = jax.block_until_ready(model_forward(x1s, x2s, None))
    refs = _reference(x1s, x2s)
    assert outs.shape == refs.shape
    assert jnp.allclose(outs, refs, atol=1e-3, rtol=1e-3)

    # Case 1: small square, fused path, with the unused `inp` argument.
    x1 = jax.random.normal(k1, (8, 8), dtype=jnp.float32)
    x2 = jax.random.normal(k2, (8, 8), dtype=jnp.float32)
    inp = jax.random.normal(k3, (8, 8), dtype=jnp.float32)       # unused, mirrors signature
    out = jax.block_until_ready(model_forward(x1, x2, inp))
    ref = _reference(x1, x2)
    assert out.shape == ref.shape
    assert jnp.allclose(out, ref, atol=1e-3, rtol=1e-3)

    # Case 2: force the two-stage tiled streaming path (2 grid steps, 128-aligned
    # chunked stores on the flat kernel, VMEM-resident S).
    x1b = jax.random.normal(k4, (16, 16), dtype=jnp.float32)
    x2b = jax.random.normal(k5, (16, 16), dtype=jnp.float32)
    outb = jax.block_until_ready(model_forward(x1b, x2b, None, block_rows=8))
    refb = _reference(x1b, x2b)
    assert outb.shape == refb.shape
    assert jnp.allclose(outb, refb, atol=1e-3, rtol=1e-3)

    print("KERNEL_OK")
</pallas_src>

<mosaic_0001>
module attributes {stable_mosaic.version = 11 : i64} {
  func.func @_fused_kernel(%arg0: memref<3x3xf32, #tpu.memory_space<vmem>>, %arg1: memref<3x3xf32, #tpu.memory_space<vmem>>, %arg2: memref<3x3x3xf32, #tpu.memory_space<vmem>>) attributes {dimension_semantics = [], scalar_prefetch = 0 : i64, scratch_operands = 0 : i64, tpu.core_type = #tpu.core_type<tc>} {
    %c0 = arith.constant 0 : index
    %c0_0 = arith.constant 0 : index
    %0 = vector.load %arg0[%c0, %c0_0] : memref<3x3xf32, #tpu.memory_space<vmem>>, vector<3x3xf32>
    %c0_1 = arith.constant 0 : index
    %c0_2 = arith.constant 0 : index
    %1 = vector.load %arg1[%c0_1, %c0_2] : memref<3x3xf32, #tpu.memory_space<vmem>>, vector<3x3xf32>
    %cst = arith.constant dense<0.000000e+00> : vector<3x3xf32>
    %2 = tpu.matmul %0, %1, %cst {dimension_numbers = #tpu.dot_dimension_numbers<[1], [0], [0], [1], [0, 0, 1, 1], [], []>} : vector<3x3xf32>, vector<3x3xf32>, vector<3x3xf32> -> vector<3x3xf32>
    %cst_3 = arith.constant dense<0.000000e+00> : vector<3x3xf32>
    %3 = tpu.matmul %1, %2, %cst_3 {dimension_numbers = #tpu.dot_dimension_numbers<[1], [0], [0], [1], [0, 0, 1, 1], [], []>} : vector<3x3xf32>, vector<3x3xf32>, vector<3x3xf32> -> vector<3x3xf32>
    %4 = arith.addf %2, %3 : vector<3x3xf32>
    %5 = vector.shape_cast %0 : vector<3x3xf32> to vector<3x1x3xf32>
    %6 = vector.shape_cast %4 : vector<3x3xf32> to vector<1x3x3xf32>
    %7 = vector.broadcast %5 : vector<3x1x3xf32> to vector<3x3x3xf32>
    %8 = vector.broadcast %6 : vector<1x3x3xf32> to vector<3x3x3xf32>
    %9 = arith.addf %7, %8 : vector<3x3x3xf32>
    %c0_4 = arith.constant 0 : index
    %c0_5 = arith.constant 0 : index
    %c0_6 = arith.constant 0 : index
    %10 = vector.load %arg2[%c0_4, %c0_5, %c0_6] : memref<3x3x3xf32, #tpu.memory_space<vmem>>, vector<3x3x3xf32>
    tpu.vector_store %arg2[%c0_4, %c0_5, %c0_6], %9 {strides = array<i32>} : memref<3x3x3xf32, #tpu.memory_space<vmem>>, vector<3x3x3xf32>,
    return
  }
}

</mosaic_0001>

<bundles_post_ra>
// kernel: tpu_custom_call.1
= control target key start
LH: loop header
LB: loop body
LE: loop exit
PB: predicated region body
PF: predicated region fallthrough
CT: control target
= control target key end

     0   :  { %7 = vsyncpa [#allocation3], 0  ;;  %s412_s0 = inlined_call_operand.hbm [shape: f32[3,3], index: 0, kind: input, shape index: {}]   ;;  %s413_s1 = inlined_call_operand.hbm [shape: f32[3,3], index: 1, kind: input, shape index: {}]   ;;  %s414_s2 = inlined_call_operand.hbm [shape: f32[3,3,3], index: 2, kind: output, shape index: {}]  }
   0x1   :  { %8 = vsyncpa [#allocation6], 0 }
   0x2   :  { %9 = vsyncpa [#allocation4], 0  ;;  %s353_s9 = smov [#allocation2]   ;;  %s354_s11 = smov [#allocation5]  }
   0x3   :  { %s16_s10 = sshll.u32 %s353_s9, 4  ;;  %s26_s12 = sshll.u32 %s354_s11, 4  ;;  %s17_s10 = int_to_ptr.vmem [resolvable:$true] %s16_s10  ;;  %s27_s12 = int_to_ptr.vmem [resolvable:$true] %s26_s12 }
   0x4   :  { %s281_s15 = scalar_lea.hbm %s412_s0, 64 }
   0x5   :  { %p282_p0 = scmp.ne.s32.totalorder %s412_s0, %s281_s15  ;;  %p285_p1 = scmp.lt.u32.totalorder %s281_s15, %s412_s0 }
   0x7   :  { %p287_p2 = pnand %p285_p1, %p282_p0 }
   0x9   :  { %290 = shalt.err (!%p287_p2)
}
   0xa   :  { %s291_s20 = scalar_lea.vmem %s17_s10, 64  ;;  %p296_p4 = scmp.lt.s32.totalorder %s17_s10, %s17_s10 }
   0xb   :  { %p292_p3 = scmp.ne.s32.totalorder %s17_s10, %s291_s20  ;;  %p297_p5 = scmp.lt.s32.totalorder %s291_s20, %s291_s20 }
   0xd   :  { %p298_p6 = por %p297_p5, %p296_p4 }
   0xf   :  { %p299_p7 = pnand %p298_p6, %p292_p3 }
  0x11   :  { %302 = shalt.err (!%p299_p7)
}
  0x12   :  { %19 = dma.hbm_to_vmem [thread:$0]  %s412_s0, 64, %s17_s10, [#allocation3]  }
  0x13   :  { %s303_s25 = scalar_lea.hbm %s413_s1, 64 }
  0x14   :  { %p304_p8 = scmp.ne.s32.totalorder %s413_s1, %s303_s25  ;;  %p307_p9 = scmp.lt.u32.totalorder %s303_s25, %s413_s1 }
  0x16   :  { %p309_p10 = pnand %p307_p9, %p304_p8 }
  0x18   :  { %312 = shalt.err (!%p309_p10)
}
  0x19   :  { %s313_s30 = scalar_lea.vmem %s27_s12, 64  ;;  %p318_p12 = scmp.lt.s32.totalorder %s27_s12, %s27_s12 }
  0x1a   :  { %p314_p11 = scmp.ne.s32.totalorder %s27_s12, %s313_s30  ;;  %p319_p13 = scmp.lt.s32.totalorder %s313_s30, %s313_s30 }
  0x1c   :  { %p320_p0 = por %p319_p13, %p318_p12 }
  0x1e   :  { %p321_p1 = pnand %p320_p0, %p314_p11 }
  0x20   :  { %324 = shalt.err (!%p321_p1)
}
  0x21   :  { %29 = dma.hbm_to_vmem [thread:$0]  %s413_s1, 64, %s27_s12, [#allocation6]  }
  0x22   :  { %347 = dma.done.wait [#allocation3], 64  }
  0x23   :  { %348 = vsyncadd [#allocation3], 4294967232 }
  0x24   :  { %349 = dma.done.wait [#allocation6], 64  }
  0x25   :  { %350 = vsyncadd [#allocation6], 4294967232  ;;  %v355_v0 = vmov 0.0   ;;  %vm356_vm0 = vmmov 0   ;;  %vm42_vm1 = vcmask 1042432   ;;  %vm38_vm2 = vcmask 23552  }
  0x26   :  { %263 = vmatprep.subr.mxu0 %v355_v0  ;;  %265 = vmatprep.mubr.msk.f32.mxu0 %vm356_vm0, %v355_v0  ;;  %v37_v1 = vld [vmem:[#allocation5] sm:$0x7]  ;;  %v36_v2 = vld [vmem:[#allocation2] sm:$0x7]  ;;  %v357_v5 = vmov 1966171168   ;;  %v195_v7 = vlaneseq }
  0x27   :  { %268 = vmatprep.subr.mxu1 %v355_v0  ;;  %270 = vmatprep.mubr.msk.f32.mxu1 %vm356_vm0, %v355_v0  ;;  %v193_v6 = vunpack.c.l.s4 %v357_v5  ;;  %s358_s1 = smov [#allocation7]   ;;  %vm233_vm3 = vcmask 18432  }
  0x28   :  { %264 = vmatpush3.msk.msra.mxu0 %vm42_vm1, %v37_v1  ;;  %v196_v9 = vshrl.u32 %v195_v7, 7  ;;  %s242_s4 = sshll.u32 %s358_s1, 4  ;;  %s243_s4 = int_to_ptr.vmem [resolvable:$true] %s242_s4 }
  0x29   :  { %266 = vmatmul.mubr.msk.f32.vlgmr.msra.gmra.mrb[0].mxu0 %vm38_vm2, %v36_v2  ;;  %v194_v8 = vunpack.c.0.s8 %v193_v6  ;;  %s325_s5 = scalar_lea.vmem %s243_s4, 192  ;;  %p330_p3 = scmp.lt.s32.totalorder %s243_s4, %s243_s4 }
  0x2a   :  { %v217_v16 = vsub.s32 0, %v196_v9  ;;  %p326_p2 = scmp.ne.s32.totalorder %s243_s4, %s325_s5  ;;  %p331_p4 = scmp.lt.s32.totalorder %s325_s5, %s325_s5 }
  0x2b   :  { %v197_v10 = vsub.s32 %v194_v8, %v196_v9 }
  0x2c   :  { %p332_p5 = por %p331_p4, %p330_p3 }
  0x2d   :  { %v198_v11 = vrot.slane %v36_v2, %v197_v10 }
  0x2e   :  { %p333_p6 = pnand %p332_p5, %p326_p2 }
  0x2f   :  { %v199_v12 = vcombine.high %v198_v11, %v198_v11  ;;  %v206_v13 = vrot.slane %v198_v11, %v197_v10 }
  0x31   :  { %v213_v14 = vrot.slane %v199_v12, %v197_v10  ;;  %v214_v15 = vcombine.high %v206_v13, %v206_v13  ;;  %v218_v17 = vrot.slane %v206_v13, %v217_v16 }
  0x33   :  { %v222_v18 = vrot.slane %v213_v14, %v217_v16  ;;  %v226_v19 = vrot.slane %v214_v15, %v217_v16 }
  0xfc   :  { %v112_v3 = vpop.f32.mrb[0].mxu0 }
  0xfd   :  { %v267_v4 = vpop.f32.mrb[1].mxu0  ;;  %269 = vmatpush3.msk.msra.mxu1 %vm42_vm1, %v112_v3 }
  0xfe   :  { %271 = vmatmul.mubr.msk.f32.vlgmr.msra.gmra.mrb[0].mxu1 %vm38_vm2, %v37_v1 }
 0x1d1   :  { %v187_v20 = vpop.f32.mrb[0].mxu1 }
 0x1d2   :  { %v191_v21 = vadd.f32 %v187_v20, %v112_v3  ;;  %v272_v22 = vpop.f32.mrb[1].mxu1 }
 0x1d4   :  { %v230_v23 = vadd.f32 %v218_v17, %v191_v21  ;;  %v231_v24 = vadd.f32 %v222_v18, %v191_v21  ;;  %v232_v25 = vadd.f32 %v226_v19, %v191_v21 }
 0x1d6   :  { %234 = vst.msk [vmem:[#allocation7] sm:$0x7] %vm233_vm3, %v230_v23  ;;  %235 = vst.msk [vmem:[#allocation7 + $0x4] sm:$0x7] %vm233_vm3, %v231_v24 }
 0x1d7   :  { %236 = vst.msk [vmem:[#allocation7 + $0x8] sm:$0x7] %vm233_vm3, %v232_v25 }
 0x1d8   :  { %336 = shalt.err (!%p333_p6)
}
 0x1d9   :  { %s337_s8 = scalar_lea.hbm %s414_s2, 192 }
 0x1da   :  { %p338_p7 = scmp.ne.s32.totalorder %s414_s2, %s337_s8  ;;  %p341_p8 = scmp.lt.u32.totalorder %s337_s8, %s414_s2 }
 0x1dc   :  { %p343_p9 = pnand %p341_p8, %p338_p7 }
 0x1de   :  { %346 = shalt.err (!%p343_p9)
}
 0x1df   :  { %s359_s13 = smov 64   ;;  %s360_s14 = smov 4  }
 0x1e0   :  { %248 = dma.vmem_to_hbm [thread:$0]  %s243_s4, 192, %s414_s2, [#allocation4], %s359_s13, %s359_s13, %s360_s14  }
 0x1e1   :  { %351 = dma.done.wait [#allocation4], 192  }
 0x1e2   :  { %352 = vsyncadd [#allocation4], 4294967104 }
 0x1e3   :  { %252 = vsyncpa [#allocation3], 1 }
 0x1e4   :  { %253 = vsyncpa [#allocation6], 1 }
 0x1e5   :  { %254 = vsyncpa [#allocation4], 1 }

</bundles_post_ra>
